<compile_context>
chip_gen: v5e
topology: v5e:2x2
jax: 0.10.0
libtpu: 0.0.40
codegen_flags: <defaults>
</compile_context>

<pallas_src>
import math
import jax
import jax.numpy as jnp
from jax import lax
from jax.experimental import pallas as pl
from jax.experimental.pallas import tpu as pltpu


def conv_bias_relu_kernel(x_ref, w_ref, b_ref, o_ref):
    # x_ref: (1, Hp, W*Cin)          bf16 H-padded input rows (W pad folded into w_ref)
    # w_ref: (KH, W*Cin, Wout*Cout)  bf16 banded (Toeplitz-over-W) weights
    # b_ref: (1, Wout*Cout)          f32 bias tiled across Wout
    # o_ref: (1, TH, Wout*Cout)      lane-dense output tile
    th, wc = o_ref.shape[1], o_ref.shape[2]
    kh_total = w_ref.shape[0]

    t = pl.program_id(1)
    row0 = pl.multiple_of(t * th, th)                       # sublane-aligned window start
    xwin = x_ref[0, pl.ds(row0, th + kh_total - 1), :]      # (TH+KH-1, W*Cin)

    # Accumulator seeded with the broadcast bias (no separate full-output add).
    acc = jnp.broadcast_to(b_ref[...], (th, wc)).astype(jnp.float32)
    for kh in range(kh_total):                              # static unroll, KH matmuls
        acc = acc + jnp.dot(xwin[kh:kh + th, :], w_ref[kh],
                            preferred_element_type=jnp.float32)

    o_ref[0] = jnp.maximum(acc, 0.0).astype(o_ref.dtype)    # ReLU, f32 epilogue


def conv_module_forward(x_nchw, w_oihw, bias, *, stride=1, padding=1, dilation=1,
                        groups=1, block_h=8, compute_dtype=jnp.bfloat16):
    """ConvModule forward (conv -> (no norm) -> relu) for the module defaults."""
    assert stride == 1 and dilation == 1 and groups == 1, \
        "kernel implements the ConvModule defaults (stride=1, dilation=1, groups=1)"
    n, cin, h, w = x_nchw.shape
    cout, cin_w, kh, kw = w_oihw.shape
    assert cin_w == cin

    hp = h + 2 * padding
    hout = hp - kh + 1
    wout = w + 2 * padding - kw + 1
    wcin, wcout = w * cin, wout * cout

    # ---- glue: lane-dense activation layout (N, Hp, W*Cin); H-padding only ----
    x2d = jnp.transpose(x_nchw, (0, 2, 3, 1)).reshape(n, h, wcin)
    x2d = jnp.pad(x2d, ((0, 0), (padding, padding), (0, 0)))
    x2d = x2d.astype(compute_dtype)

    # ---- glue: banded (Toeplitz-over-W) weights; W zero-padding folded in ----
    # wt[kh, wi*Cin + c, wo*Cout + o] = w[o, c, kh, wi - wo + padding] (if valid kw)
    w_hwio = jnp.transpose(w_oihw, (2, 3, 1, 0))            # (KH, KW, Cin, Cout)
    wi_idx = jnp.arange(w)[None, :, None]                   # input col
    wo_idx = jnp.arange(wout)[None, None, :]                # output col
    kw_idx = jnp.arange(kw)[:, None, None]                  # kernel tap
    sel = (wi_idx == wo_idx + kw_idx - padding).astype(w_hwio.dtype)   # (KW, W, Wout)
    wt = jnp.einsum("kwv,hkco->hwcvo", sel, w_hwio)         # (KH, W, Cin, Wout, Cout)
    wt = wt.reshape(kh, wcin, wcout).astype(compute_dtype)

    # Bias tiled across Wout so it is lane-dense like the output slab (kept f32).
    brow = jnp.tile(bias.astype(jnp.float32), wout).reshape(1, wcout)

    th = block_h if hout % block_h == 0 else hout
    grid = (n, hout // th)

    out2d = pl.pallas_call(
        conv_bias_relu_kernel,
        out_shape=jax.ShapeDtypeStruct((n, hout, wcout), jnp.float32),
        grid_spec=pltpu.PrefetchScalarGridSpec(
            num_scalar_prefetch=0,
            grid=grid,
            in_specs=[
                pl.BlockSpec((1, hp, wcin), lambda b, t: (b, 0, 0)),
                pl.BlockSpec((kh, wcin, wcout), lambda b, t: (0, 0, 0)),
                pl.BlockSpec((1, wcout), lambda b, t: (0, 0)),
            ],
            out_specs=pl.BlockSpec((1, th, wcout), lambda b, t: (b, t, 0)),
        ),
        compiler_params=pltpu.CompilerParams(
            dimension_semantics=("parallel", "parallel")),
    )(x2d, wt, brow)

    # ---- glue: back to NCHW to match the PyTorch output convention ----
    out = out2d.reshape(n, hout, wout, cout)
    return jnp.transpose(out, (0, 3, 1, 2))


def init_params(key, in_channels, out_channels, kernel_size):
    """kaiming_normal_(mode='fan_out', nonlinearity='relu'), bias=0 (matches init_weights)."""
    fan_out = out_channels * kernel_size * kernel_size
    std = math.sqrt(2.0 / fan_out)
    w = std * jax.random.normal(
        key, (out_channels, in_channels, kernel_size, kernel_size), jnp.float32)
    b = jnp.zeros((out_channels,), jnp.float32)
    return w, b


if __name__ == "__main__":
    # ConvModule(in_channels=4, out_channels=8, kernel_size=3, padding=1)
    N, CIN, H, W = 2, 4, 16, 16
    COUT, K, PAD = 8, 3, 1

    key = jax.random.PRNGKey(0)
    key_x, key_w, key_b = jax.random.split(key, 3)
    x = jax.random.normal(key_x, (N, CIN, H, W), jnp.float32)
    w, _ = init_params(key_w, CIN, COUT, K)
    # Nonzero bias so the bias-add path is exercised (module init zeroes it, but
    # forward() must handle any bias value).
    b = 0.1 * jax.random.normal(key_b, (COUT,), jnp.float32)

    out = conv_module_forward(x, w, b, padding=PAD)
    out = jax.block_until_ready(out)

    # Reference: XLA conv with the same bf16 operand rounding and f32 accumulation.
    ref = lax.conv_general_dilated(
        x.astype(jnp.bfloat16), w.astype(jnp.bfloat16),
        window_strides=(1, 1), padding=((PAD, PAD), (PAD, PAD)),
        dimension_numbers=("NCHW", "OIHW", "NCHW"),
        preferred_element_type=jnp.float32)
    ref = jnp.maximum(ref + b[None, :, None, None], 0.0)

    assert out.shape == (N, COUT, H, W)
    err = float(jnp.max(jnp.abs(out - ref)))
    assert err < 2e-3, f"mismatch vs reference conv: max abs err = {err}"

    print("KERNEL_OK")
</pallas_src>

<mosaic_0001>
module attributes {stable_mosaic.version = 11 : i64} {
  func.func @conv_bias_relu_kernel(%arg0: i32, %arg1: i32, %arg2: memref<1x18x64xbf16, #tpu.memory_space<vmem>>, %arg3: memref<3x64x128xbf16, #tpu.memory_space<vmem>>, %arg4: memref<1x128xf32, #tpu.memory_space<vmem>>, %arg5: memref<1x8x128xf32, #tpu.memory_space<vmem>>) attributes {dimension_semantics = [#tpu.dimension_semantics<parallel>, #tpu.dimension_semantics<parallel>], iteration_bounds = array<i64: 2, 2>, scalar_prefetch = 0 : i64, scratch_operands = 0 : i64, tpu.core_type = #tpu.core_type<tc>, window_params = [{transform_indices = @transform_0, window_bounds = array<i64: 1, 18, 64>}, {pipeline_mode = #tpu.pipeline_mode<synchronous>, transform_indices = @transform_1, window_bounds = array<i64: 3, 64, 128>}, {pipeline_mode = #tpu.pipeline_mode<synchronous>, transform_indices = @transform_2, window_bounds = array<i64: 1, 128>}, {transform_indices = @transform_3, window_bounds = array<i64: 1, 8, 128>}]} {
    %c8_i32 = arith.constant 8 : i32
    %0 = arith.muli %arg1, %c8_i32 : i32
    %1 = tpu.assume_multiple %0, 8 : i32
    %c0 = arith.constant 0 : index
    %2 = arith.index_cast %1 : i32 to index
    %c0_0 = arith.constant 0 : index
    %3 = vector.load %arg2[%c0, %2, %c0_0] : memref<1x18x64xbf16, #tpu.memory_space<vmem>>, vector<1x10x64xbf16>
    %4 = vector.shape_cast %3 : vector<1x10x64xbf16> to vector<10x64xbf16>
    %c0_1 = arith.constant 0 : index
    %c0_2 = arith.constant 0 : index
    %5 = vector.load %arg4[%c0_1, %c0_2] : memref<1x128xf32, #tpu.memory_space<vmem>>, vector<1x128xf32>
    %6 = vector.shape_cast %5 : vector<1x128xf32> to vector<1x128xf32>
    %7 = vector.broadcast %6 : vector<1x128xf32> to vector<8x128xf32>
    %8 = vector.extract_strided_slice %4 {offsets = [0, 0], sizes = [8, 64], strides = [1, 1]} : vector<10x64xbf16> to vector<8x64xbf16>
    %c0_3 = arith.constant 0 : index
    %c0_4 = arith.constant 0 : index
    %c0_5 = arith.constant 0 : index
    %9 = vector.load %arg3[%c0_3, %c0_4, %c0_5] : memref<3x64x128xbf16, #tpu.memory_space<vmem>>, vector<1x64x128xbf16>
    %10 = vector.shape_cast %9 : vector<1x64x128xbf16> to vector<64x128xbf16>
    %cst = arith.constant dense<0.000000e+00> : vector<8x128xf32>
    %11 = tpu.matmul %8, %10, %cst {dimension_numbers = #tpu.dot_dimension_numbers<[1], [0], [0], [1], [0, 0, 1, 1], [], []>} : vector<8x64xbf16>, vector<64x128xbf16>, vector<8x128xf32> -> vector<8x128xf32>
    %12 = arith.addf %7, %11 : vector<8x128xf32>
    %13 = vector.extract_strided_slice %4 {offsets = [1, 0], sizes = [8, 64], strides = [1, 1]} : vector<10x64xbf16> to vector<8x64xbf16>
    %c1 = arith.constant 1 : index
    %c0_6 = arith.constant 0 : index
    %c0_7 = arith.constant 0 : index
    %14 = vector.load %arg3[%c1, %c0_6, %c0_7] : memref<3x64x128xbf16, #tpu.memory_space<vmem>>, vector<1x64x128xbf16>
    %15 = vector.shape_cast %14 : vector<1x64x128xbf16> to vector<64x128xbf16>
    %cst_8 = arith.constant dense<0.000000e+00> : vector<8x128xf32>
    %16 = tpu.matmul %13, %15, %cst_8 {dimension_numbers = #tpu.dot_dimension_numbers<[1], [0], [0], [1], [0, 0, 1, 1], [], []>} : vector<8x64xbf16>, vector<64x128xbf16>, vector<8x128xf32> -> vector<8x128xf32>
    %17 = arith.addf %12, %16 : vector<8x128xf32>
    %18 = vector.extract_strided_slice %4 {offsets = [2, 0], sizes = [8, 64], strides = [1, 1]} : vector<10x64xbf16> to vector<8x64xbf16>
    %c2 = arith.constant 2 : index
    %c0_9 = arith.constant 0 : index
    %c0_10 = arith.constant 0 : index
    %19 = vector.load %arg3[%c2, %c0_9, %c0_10] : memref<3x64x128xbf16, #tpu.memory_space<vmem>>, vector<1x64x128xbf16>
    %20 = vector.shape_cast %19 : vector<1x64x128xbf16> to vector<64x128xbf16>
    %cst_11 = arith.constant dense<0.000000e+00> : vector<8x128xf32>
    %21 = tpu.matmul %18, %20, %cst_11 {dimension_numbers = #tpu.dot_dimension_numbers<[1], [0], [0], [1], [0, 0, 1, 1], [], []>} : vector<8x64xbf16>, vector<64x128xbf16>, vector<8x128xf32> -> vector<8x128xf32>
    %22 = arith.addf %17, %21 : vector<8x128xf32>
    %cst_12 = arith.constant 0.000000e+00 : f32
    %23 = vector.broadcast %cst_12 : f32 to vector<8x128xf32>
    %24 = arith.maximumf %22, %23 : vector<8x128xf32>
    %c0_13 = arith.constant 0 : index
    %c0_14 = arith.constant 0 : index
    %c0_15 = arith.constant 0 : index
    %25 = vector.load %arg5[%c0_13, %c0_14, %c0_15] : memref<1x8x128xf32, #tpu.memory_space<vmem>>, vector<1x8x128xf32>
    %26 = vector.shape_cast %25 : vector<1x8x128xf32> to vector<8x128xf32>
    %27 = vector.shape_cast %24 : vector<8x128xf32> to vector<1x8x128xf32>
    tpu.vector_store %arg5[%c0_13, %c0_14, %c0_15], %27 {strides = array<i32>} : memref<1x8x128xf32, #tpu.memory_space<vmem>>, vector<1x8x128xf32>,
    return
  }
  func.func @transform_0(%arg0: i32, %arg1: i32) -> (i32, i32, i32) {
    %c0_i32 = arith.constant 0 : i32
    %c0_i32_0 = arith.constant 0 : i32
    %c0_i32_1 = arith.constant 0 : i32
    return %arg0, %c0_i32, %c0_i32_0 : i32, i32, i32
  }
  func.func @transform_1(%arg0: i32, %arg1: i32) -> (i32, i32, i32) {
    %c0_i32 = arith.constant 0 : i32
    %c0_i32_0 = arith.constant 0 : i32
    %c0_i32_1 = arith.constant 0 : i32
    %c0_i32_2 = arith.constant 0 : i32
    return %c0_i32, %c0_i32_0, %c0_i32_1 : i32, i32, i32
  }
  func.func @transform_2(%arg0: i32, %arg1: i32) -> (i32, i32) {
    %c0_i32 = arith.constant 0 : i32
    %c0_i32_0 = arith.constant 0 : i32
    %c0_i32_1 = arith.constant 0 : i32
    return %c0_i32, %c0_i32_0 : i32, i32
  }
  func.func @transform_3(%arg0: i32, %arg1: i32) -> (i32, i32, i32) {
    %c0_i32 = arith.constant 0 : i32
    %c0_i32_0 = arith.constant 0 : i32
    return %arg0, %arg1, %c0_i32 : i32, i32, i32
  }
}

</mosaic_0001>

<bundles_post_ra>
// kernel: tpu_custom_call.1
= control target key start
LH: loop header
LB: loop body
LE: loop exit
PB: predicated region body
PF: predicated region fallthrough
CT: control target
= control target key end

     0   :  { %8 = vsyncpa [#allocation3], 0  ;;  %s949_s0 = inlined_call_operand.vmem [shape: bf16[2,18,64], index: 0, kind: input, shape index: {}]   ;;  %s950_s1 = inlined_call_operand.hbm [shape: bf16[3,64,128], index: 1, kind: input, shape index: {}]   ;;  %s951_s2 = inlined_call_operand.vmem [shape: f32[1,128], index: 2, kind: input, shape index: {}]   ;;  %s952_s3 = inlined_call_operand.hbm [shape: f32[2,16,128], index: 3, kind: output, shape index: {}]  }
   0x1   :  { %9 = vsyncpa [#allocation4], 0 }
   0x2   :  { %11 = vsyncpa [#allocation4 + $0x1], 0  ;;  %s804_s12 = smov 0   ;;  %s806_s13 = smov 0  }
   0x3   :  { %s808_s14 = smov 0   ;;  %s810_s15 = smov 0  }
   0x4   :  { %s812_s16 = smov 0   ;;  %s814_s17 = smov 0  }
   0x5   :  { %s816_s18 = smov 0   ;;  %s818_s19 = smov 0  }
   0x6 LB: > { %s481_s20 = sadd.s32 4294967295, %s779_s19   ;;  %s482_s21 = sadd.s32 4294967294, %s779_s19   ;;  %s779_s19 = sphi %s818_s19, %s17_s19   ;;  %s775_s18 = sphi %s816_s18, %s963_s18   ;;  %s771_s17 = sphi %s814_s17, %s962_s17   ;;  %s767_s16 = sphi %s812_s16, %s961_s16   ;;  %s763_s15 = sphi %s810_s15, %s960_s15   ;;  %s759_s14 = sphi %s808_s14, %s959_s14   ;;  %s755_s13 = sphi %s806_s13, %s958_s13   ;;  %s751_s12 = sphi %s804_s12, %s957_s12  }
   0x7   : > { %s26_s22 = sadd.s32 1, %s771_s17  ;;  %s29_s23 = sadd.s32 1, %s775_s18 }
   0x8   : > { %p27_p0 = scmp.ge.s32.totalorder %s26_s22, 2  ;;  %s106_s24 = sadd.s32 1, %s759_s14 }
   0x9   : > { %p116_p1 = scmp.ne.s32.totalorder %s759_s14, %s755_s13  ;;  %p117_p2 = scmp.eq.s32.totalorder %s481_s20, 3 }
   0xa   : > { %s965_s22 = smov (%p27_p0, %s26_s22), 0  ;;  %s967_s23 = smov (!%p27_p0, %s29_s23), %s775_s18 }
   0xb   : > { %s102_s25 = ssub.s32 %s771_s17, %s965_s22  ;;  %p856_p3 = por %p117_p2, %p116_p1 }
   0xc   : > { %p31_p4 = scmp.ge.s32.totalorder %s967_s23, 2  ;;  %p122_p5 = scmp.ne.s32.totalorder %s755_s13, %s751_s12 }
   0xd   : > { %p123_p6 = scmp.eq.s32.totalorder %s482_s21, 3  ;;  %p483_p7 = scmp.ge.s32.totalorder %s779_s19, 1 }
   0xe   : > { %s969_s23 = smov (%p31_p4, %s967_s23), 0  ;;  %p130_p9 = scmp.lt.s32.totalorder %s779_s19, 5 }
   0xf   : > { %p865_p8 = por %p123_p6, %p122_p5  ;;  %s101_s28 = ssub.s32 %s775_s18, %s969_s23 }
  0x10   : > { %s103_s29 = sor.u32 %s102_s25, %s101_s28  ;;  %p872_p10 = pnand %p483_p7, %p130_p9 }
  0x11   : > { %p104_p11 = scmp.eq.s32.totalorder %s103_s29, 0  ;;  %p876_p12 = scmp.eq.s32.totalorder %s481_s20, 0 }
  0x12   : > { %p572_p13 = pneg %p872_p10  ;;  %s141_s7 = sshll.u32 %s950_s1, 4  ;;  %s142_s7 = int_to_ptr.hbm [resolvable:$true] %s141_s7 }
  0x13   : > { %s886_s8 = scalar_select %p104_p11, %s759_s14, %s106_s24  }
  0x14   : > { %s781_s9 = smov [#allocation2]   ;;  %p573_p0 = pnand %p876_p12, %p572_p13 }
  0x15   : > { %s143_s10 = sshll.u32 %s781_s9, 4  ;;  %s782_s11 = smov 64   ;;  %s144_s10 = int_to_ptr.vmem [resolvable:$true] %s143_s10 }
  0x16   : > { %s783_s20 = smov 4   ;;  %170 = sbr.rel (%p872_p10) target bundleno = 186 (0xba), region = 32 }
  0x17   : > { %575 = dma.hbm_to_vmem [thread:$0]  (!%p573_p0), %s142_s7, 1536, %s144_s10, [#allocation3], %s782_s11, %s782_s11, %s783_s20  }
  0x1b   : > { %742 = dma.done.wait (%p876_p12), [#allocation3], 1536  }
  0x1c   : > { %744 = vsyncadd (%p876_p12), [#allocation3], 4294965760  ;;  %p195_p1 = scmp.lt.s32.totalorder %s767_s16, 1  ;;  %s490_s21 = sshll.u32 %s763_s15, 3  ;;  %v556_v0 = vld [vmem:[#allocation2 + $0x18] sm:$0xff]  ;;  %v555_v3 = vld [vmem:[#allocation2 + $0x10] sm:$0xff] }
  0x1d   : > { %s202_s24 = sshra.s32 %s490_s21, 3  ;;  %v560_v1 = vld [vmem:[#allocation2 + $0x38] sm:$0xff]  ;;  %252 = vmatpush.bf16.msra.mxu0 %v556_v0  ;;  %v559_v4 = vld [vmem:[#allocation2 + $0x30] sm:$0xff]  ;;  %v554_v9 = vld [vmem:[#allocation2 + $0x8] sm:$0xff]  ;;  %vm244_vm0 = vcmask 523264   ;;  %s548_s4 = sshll.u32 %s767_s16, 1 }
  0x1e   : > { %s196_s25 = scalar_select %p195_p1, %s767_s16, 1  ;;  %v564_v2 = vld [vmem:[#allocation2 + $0x58] sm:$0xff]  ;;  %314 = vmatpush.bf16.msra.mxu1 %v560_v1  ;;  %v563_v5 = vld [vmem:[#allocation2 + $0x50] sm:$0xff]  ;;  %v558_v10 = vld [vmem:[#allocation2 + $0x28] sm:$0xff] }
  0x1f   : > { %s491_s29 = sshll.u32 %s202_s24, 2  ;;  %365 = vmatpush.bf16.msra.mxu2 %v564_v2  ;;  %v562_v11 = vld [vmem:[#allocation2 + $0x48] sm:$0xff]  ;;  %v553_v15 = vld [vmem:[#allocation2] sm:$0xff]  ;;  %s192_s11 = sand.u32 1, %s755_s13  }
  0x20   : > { %s565_s28 = smul.u32 12, %s196_s25  ;;  %v557_v16 = vld [vmem:[#allocation2 + $0x20] sm:$0xff]  ;;  %s388_s20 = sadd.s32 %s763_s15, %s548_s4 }
  0x21   : > { %253 = vmatpush.bf16.msra.mxu0 %v555_v3  ;;  %v561_v17 = vld [vmem:[#allocation2 + $0x40] sm:$0xff]  ;;  %s488_s21 = sshll.u32 %s192_s11, 3  ;;  %s549_s24 = sshll.u32 %s388_s20, 3 }
  0x22   : > { %s199_s30 = scalar_lea.vmem %s949_s0, %s565_s28  ;;  %315 = vmatpush.bf16.msra.mxu1 %v559_v4  ;;  %v650_v21 = vld [vmem:[%s951_s2] ss:$0 sm:$0xff]  ;;  %s194_s5 = scalar_lea.vmem [#allocation5], %s488_s21 }
  0x23   : > { %s205_s7 = scalar_lea.vmem %s199_s30, %s491_s29  ;;  %366 = vmatpush.bf16.msra.mxu2 %v563_v5  ;;  %s390_s29 = scalar_lea.hbm %s952_s3, %s549_s24 }
  0x24   : > { %v511_v6 = vld [vmem:[%s205_s7] sm:$0xf]  ;;  %v552_v7 = vld [vmem:[%s205_s7] sm:$0x10]  ;;  %s392_s16 = sshll.u32 %s194_s5, 4  ;;  %s394_s6 = sshll.u32 %s390_s29, 4  ;;  %s393_s16 = int_to_ptr.vmem [resolvable:$true] %s392_s16  ;;  %s395_s6 = int_to_ptr.hbm [resolvable:$true] %s394_s6 }
  0x25   : > { %v512_v8 = vor.u32 %v552_v7, %v511_v6  ;;  %254 = vmatpush.bf16.msra.mxu0 %v554_v9  ;;  %v206_v19 = vld [vmem:[%s205_s7] sm:$0xf]  ;;  %s378_s15 = scalar_lea.sflag [#allocation4], %s192_s11  ;;  %s695_s30 = sshra.s32 %s395_s6, 4  ;;  %s696_s30 = int_to_ptr.hbm [resolvable:$true] %s695_s30 }
  0x26   : > { %316 = vmatpush.bf16.msra.mxu1 %v558_v10  ;;  %s697_s7 = scalar_lea.hbm %s696_s30, 8  ;;  %s701_s10 = scalar_lea.hbm %s952_s3, 32 }
  0x27   : > { %v279_v12 = vshll.u32 %v512_v8, 16  ;;  %v277_v13 = vshrl.u32 %v512_v8, 16  ;;  %367 = vmatpush.bf16.msra.mxu2 %v562_v11  ;;  %v333_v20 = vrot.slane %v512_v8, 1  ;;  %p698_p2 = scmp.ne.s32.totalorder %s696_s30, %s697_s7  ;;  %p702_p6 = scmp.lt.s32.totalorder %s696_s30, %s952_s3 }
  0x28   : > { %p703_p7 = scmp.lt.s32.totalorder %s701_s10, %s697_s7 }
  0x29   : > { %v281_v14 = vrot.slane %v279_v12, 1  ;;  %255 = vmatpush.bf16.msra.mxu0 %v553_v15  ;;  %p699_p4 = pnand %p698_p2, %p856_p3 }
  0x2a   : > { %317 = vmatpush.bf16.msra.mxu1 %v557_v16  ;;  %p704_p9 = por %p703_p7, %p702_p6 }
  0x2b   : > { %v282_v18 = vor.u32 %v281_v14, %v277_v13  ;;  %368 = vmatpush.bf16.msra.mxu2 %v561_v17  ;;  %p700_p5 = pneg %p699_p4 }
  0x2c   : > { %508 = vmatmul.msk.bf16.vlgmr.msra.gmra.mxu0 %vm244_vm0, %v206_v19 }
  0x2d   : > { %529 = vmatmul.msk.bf16.vlgmr.msra.gmra.mxu1 %vm244_vm0, %v282_v18  ;;  %p705_p10 = pnand %p704_p9, %p700_p5 }
  0x2e   : > { %546 = vmatmul.msk.bf16.vlgmr.msra.gmra.mxu2 %vm244_vm0, %v333_v20 }
  0xa9   : > { %v257_v22 = vpop.f32.mrf.mxu0 }
  0xaa   : > { %v319_v23 = vpop.f32.mrf.mxu1  ;;  %v261_v24 = vadd.f32 %v650_v21, %v257_v22 }
  0xac   : > { %v323_v25 = vadd.f32 %v319_v23, %v261_v24 }
  0xb1   : > { %v370_v26 = vpop.f32.mrf.mxu2  ;;  %v259_v28 = vpop.f32.mrf.mxu0 }
  0xb2   : > { %v374_v27 = vadd.f32 %v370_v26, %v323_v25  ;;  %v321_v29 = vpop.f32.mrf.mxu1 }
  0xb4   : > { %v375_v30 = vmax.f32 %v374_v27, 0.0 }
  0xb6   : > { %376 = vst [vmem:[%s194_s5] sm:$0xff] %v375_v30 }
  0xb7   : > { %708 = shalt.err (!%p705_p10)
}
  0xb8   : > { %570 = dma.vmem_to_hbm [thread:$0]  (%p856_p3), %s393_s16, 128, %s395_s6, %s378_s15  }
  0xb9   : > { %v372_v31 = vpop.f32.mrf.mxu2 }
  0xba PF: > { %p582_p11 = scmp.ge.s32.totalorder %s779_s19, 2  ;;  %s406_s11 = sand.u32 1, %s751_s12  }
  0xbb   : > { %s407_s24 = scalar_lea.sflag [#allocation4], %s406_s11 }
  0xbc   : > { %p577_p12 = pnand %p582_p11, %p865_p8 }
  0xbe   : > { %p578_p13 = pneg %p577_p12 }
  0xc0   : > { %746 = dma.done.wait (%p578_p13), %s407_s24, 128  }
  0xc1   : > { %748 = vsyncadd (%p578_p13), %s407_s24, 4294967168  ;;  %s17_s19 = sadd.s32 1, %s779_s19   ;;  %s957_s12 = smov %s755_s13 }
  0xc2   : > { %p14_p0 = scmp.ge.s32.totalorder %s17_s19, 6   ;;  %s958_s13 = smov %s759_s14 }
  0xc3   : > { %s959_s14 = smov %s886_s8  ;;  %s960_s15 = smov %s771_s17 }
  0xc4   : > { %s961_s16 = smov %s775_s18  ;;  %s962_s17 = smov %s965_s22 }
  0xc5   : > { %s963_s18 = smov %s969_s23  ;;  %16 = sbr.rel (!%p14_p0) target bundleno = 6 (0x6), region = 75 }
  0xca   :  { %413 = vsyncpa [#allocation3], 1 }
  0xcb   :  { %415 = vsyncpa [#allocation3 + $0x1], 1 }
  0xcc   :  { %416 = vsyncpa [#allocation4], 1 }
  0xcd   :  { %418 = vsyncpa [#allocation4 + $0x1], 1 }

</bundles_post_ra>
